<compile_context>
chip_gen: v6e
topology: v6e:2x2x1
jax: 0.10.0
libtpu: 0.0.40
codegen_flags: <defaults>
</compile_context>

<pallas_src>
import jax
import jax.numpy as jnp
from jax.experimental import pallas as pl
from jax.experimental.pallas import tpu as pltpu


def _cdiv(a, b):
    return -(-a // b)


def _round_up(x, m):
    return _cdiv(x, m) * m


def _spatial_encoder_kernel(x_ref, w1_ref, b1_ref, w2_ref, b2_ref, out_ref):
    # x_ref: (tile_p, 2*P)  -- P original rows packed per lane row.
    x = x_ref[...].astype(jnp.float32)
    # Layer 1: (tile_p, 2P) @ (2P, hidden*P) block-diagonal weights, + bias, ReLU.
    h = jnp.maximum(
        jnp.dot(x, w1_ref[...], preferred_element_type=jnp.float32) + b1_ref[...],
        0.0)                                                     # (tile_p, hidden*P)
    # Layer 2: (tile_p, hidden*P) @ (hidden*P, head*P) block-diagonal weights.
    out_ref[...] = (
        jnp.dot(h, w2_ref[...], preferred_element_type=jnp.float32) + b2_ref[...]
    ).astype(out_ref.dtype)                                      # (tile_p, head*P)


def _pack_factor(hidden_dim, head_dim, max_hidden_lanes=2048):
    """How many original rows to pack per lane row (128 lanes of output)."""
    if head_dim >= 128:
        return 1
    p = max(1, 128 // head_dim)
    # Keep the packed hidden width bounded so weights / intermediates stay small.
    while p > 1 and p * hidden_dim > max_hidden_lanes:
        p //= 2
    return p


def _choose_tile(n_pack, tile_p_max):
    """Sublane-aligned packed-row tile; balances tiles so padding waste stays small."""
    n8 = _round_up(max(n_pack, 1), 8)
    t_max = max(8, _round_up(max(tile_p_max, 1), 8))
    grid = _cdiv(n8, t_max)
    tile_p = _round_up(_cdiv(n8, grid), 8)
    return tile_p, tile_p * grid, grid


def spatial_encoder_pallas(state, params, *, tile_rows=16384):
    """state: [..., 2] -> out: [..., head_dim]."""
    lead = state.shape[:-1]
    n = 1
    for d in lead:
        n *= d

    w1 = params["w1"].astype(jnp.float32)        # (2, hidden)
    b1 = params["b1"].astype(jnp.float32)        # (hidden,)
    w2 = params["w2"].astype(jnp.float32)        # (hidden, head_dim)
    b2 = params["b2"].astype(jnp.float32)        # (head_dim,)
    hidden = w1.shape[1]
    head = w2.shape[1]

    P = _pack_factor(hidden, head)

    # Block-diagonal ("row packed") parameters -- tiny, built once in the wrapper.
    eye = jnp.eye(P, dtype=jnp.float32)
    w1p = jnp.kron(eye, w1)                      # (2*P, hidden*P)
    w2p = jnp.kron(eye, w2)                      # (hidden*P, head*P)
    b1p = jnp.tile(b1, P).reshape(1, hidden * P)
    b2p = jnp.tile(b2, P).reshape(1, head * P)

    n_pack = _cdiv(n, P)
    tile_p, n_pack_pad, grid = _choose_tile(n_pack, max(1, tile_rows // P))
    n_pad = n_pack_pad * P

    state2 = state.reshape(n, 2).astype(jnp.float32)
    if n_pad != n:
        state2 = jnp.pad(state2, ((0, n_pad - n), (0, 0)))
    x_packed = state2.reshape(n_pack_pad, 2 * P)          # free row-major reshape

    out_packed = pl.pallas_call(
        _spatial_encoder_kernel,
        out_shape=jax.ShapeDtypeStruct((n_pack_pad, head * P), jnp.float32),
        grid_spec=pltpu.PrefetchScalarGridSpec(
            num_scalar_prefetch=0,
            grid=(grid,),
            in_specs=[
                pl.BlockSpec((tile_p, 2 * P), lambda i: (i, 0)),           # packed rows
                pl.BlockSpec((2 * P, hidden * P), lambda i: (0, 0)),       # w1 block-diag
                pl.BlockSpec((1, hidden * P), lambda i: (0, 0)),           # b1 tiled
                pl.BlockSpec((hidden * P, head * P), lambda i: (0, 0)),    # w2 block-diag
                pl.BlockSpec((1, head * P), lambda i: (0, 0)),             # b2 tiled
            ],
            out_specs=pl.BlockSpec((tile_p, head * P), lambda i: (i, 0)),  # lane-dense out
        ),
        compiler_params=pltpu.CompilerParams(
            dimension_semantics=("parallel",)),
    )(x_packed, w1p, b1p, w2p, b2p)

    out2d = out_packed.reshape(n_pad, head)               # free row-major reshape
    if n_pad != n:
        out2d = out2d[:n]                                  # drop zero-padded tail rows
    return out2d.reshape(*lead, head)


def make_params(key, hidden_dim, head_dim):
    """Deterministic synthetic parameters, stored as [in, out] (PyTorch-style init)."""
    ks = jax.random.split(key, 4)

    def init(k, shape, fan_in):
        bound = 1.0 / (fan_in ** 0.5)
        return jax.random.uniform(k, shape, jnp.float32, -bound, bound)

    return {
        "w1": init(ks[0], (2, hidden_dim), 2),
        "b1": init(ks[1], (hidden_dim,), 2),
        "w2": init(ks[2], (hidden_dim, head_dim), hidden_dim),
        "b2": init(ks[3], (head_dim,), hidden_dim),
    }


def spatial_encoder_ref(state, params):
    """Pure-JAX reference mirroring the PyTorch forward."""
    h = jax.nn.relu(state @ params["w1"] + params["b1"])
    return h @ params["w2"] + params["b2"]


if __name__ == "__main__":
    hidden_dim, head_dim = 32, 8
    batch, seq = 2, 8

    key = jax.random.PRNGKey(0)
    k_state, k_params = jax.random.split(key, 2)

    state = jax.random.normal(k_state, (batch, seq, 2), jnp.float32)
    params = make_params(k_params, hidden_dim, head_dim)

    out = spatial_encoder_pallas(state, params)
    out = jax.block_until_ready(out)

    ref = spatial_encoder_ref(state, params)
    assert out.shape == (batch, seq, head_dim)
    assert jnp.allclose(out, ref, atol=1e-5, rtol=1e-5)
    print("KERNEL_OK")
</pallas_src>

<mosaic_0001>
module attributes {stable_mosaic.version = 11 : i64} {
  func.func @_spatial_encoder_kernel(%arg0: i32, %arg1: memref<8x32xf32, #tpu.memory_space<vmem>>, %arg2: memref<32x512xf32, #tpu.memory_space<vmem>>, %arg3: memref<1x512xf32, #tpu.memory_space<vmem>>, %arg4: memref<512x128xf32, #tpu.memory_space<vmem>>, %arg5: memref<1x128xf32, #tpu.memory_space<vmem>>, %arg6: memref<8x128xf32, #tpu.memory_space<vmem>>) attributes {dimension_semantics = [#tpu.dimension_semantics<parallel>], iteration_bounds = array<i64: 1>, scalar_prefetch = 0 : i64, scratch_operands = 0 : i64, tpu.core_type = #tpu.core_type<tc>, window_params = [{transform_indices = @transform_0, window_bounds = array<i64: 8, 32>}, {pipeline_mode = #tpu.pipeline_mode<synchronous>, transform_indices = @transform_1, window_bounds = array<i64: 32, 512>}, {pipeline_mode = #tpu.pipeline_mode<synchronous>, transform_indices = @transform_2, window_bounds = array<i64: 1, 512>}, {pipeline_mode = #tpu.pipeline_mode<synchronous>, transform_indices = @transform_3, window_bounds = array<i64: 512, 128>}, {pipeline_mode = #tpu.pipeline_mode<synchronous>, transform_indices = @transform_4, window_bounds = array<i64: 1, 128>}, {transform_indices = @transform_5, window_bounds = array<i64: 8, 128>}]} {
    %c0 = arith.constant 0 : index
    %c0_0 = arith.constant 0 : index
    %0 = vector.load %arg1[%c0, %c0_0] : memref<8x32xf32, #tpu.memory_space<vmem>>, vector<8x32xf32>
    %c0_1 = arith.constant 0 : index
    %c0_2 = arith.constant 0 : index
    %1 = vector.load %arg2[%c0_1, %c0_2] : memref<32x512xf32, #tpu.memory_space<vmem>>, vector<32x512xf32>
    %cst = arith.constant dense<0.000000e+00> : vector<8x512xf32>
    %2 = tpu.matmul %0, %1, %cst {dimension_numbers = #tpu.dot_dimension_numbers<[1], [0], [0], [1], [0, 0, 1, 1], [], []>} : vector<8x32xf32>, vector<32x512xf32>, vector<8x512xf32> -> vector<8x512xf32>
    %c0_3 = arith.constant 0 : index
    %c0_4 = arith.constant 0 : index
    %3 = vector.load %arg3[%c0_3, %c0_4] : memref<1x512xf32, #tpu.memory_space<vmem>>, vector<1x512xf32>
    %4 = vector.broadcast %3 : vector<1x512xf32> to vector<8x512xf32>
    %5 = arith.addf %2, %4 : vector<8x512xf32>
    %cst_5 = arith.constant 0.000000e+00 : f32
    %6 = vector.broadcast %cst_5 : f32 to vector<8x512xf32>
    %7 = arith.maximumf %5, %6 : vector<8x512xf32>
    %c0_6 = arith.constant 0 : index
    %c0_7 = arith.constant 0 : index
    %8 = vector.load %arg4[%c0_6, %c0_7] : memref<512x128xf32, #tpu.memory_space<vmem>>, vector<512x128xf32>
    %cst_8 = arith.constant dense<0.000000e+00> : vector<8x128xf32>
    %9 = tpu.matmul %7, %8, %cst_8 {dimension_numbers = #tpu.dot_dimension_numbers<[1], [0], [0], [1], [0, 0, 1, 1], [], []>} : vector<8x512xf32>, vector<512x128xf32>, vector<8x128xf32> -> vector<8x128xf32>
    %c0_9 = arith.constant 0 : index
    %c0_10 = arith.constant 0 : index
    %10 = vector.load %arg5[%c0_9, %c0_10] : memref<1x128xf32, #tpu.memory_space<vmem>>, vector<1x128xf32>
    %11 = vector.broadcast %10 : vector<1x128xf32> to vector<8x128xf32>
    %12 = arith.addf %9, %11 : vector<8x128xf32>
    %c0_11 = arith.constant 0 : index
    %c0_12 = arith.constant 0 : index
    %13 = vector.load %arg6[%c0_11, %c0_12] : memref<8x128xf32, #tpu.memory_space<vmem>>, vector<8x128xf32>
    tpu.vector_store %arg6[%c0_11, %c0_12], %12 {strides = array<i32>} : memref<8x128xf32, #tpu.memory_space<vmem>>, vector<8x128xf32>,
    return
  }
  func.func @transform_0(%arg0: i32) -> (i32, i32) {
    %c0_i32 = arith.constant 0 : i32
    %c0_i32_0 = arith.constant 0 : i32
    return %arg0, %c0_i32 : i32, i32
  }
  func.func @transform_1(%arg0: i32) -> (i32, i32) {
    %c0_i32 = arith.constant 0 : i32
    %c0_i32_0 = arith.constant 0 : i32
    %c0_i32_1 = arith.constant 0 : i32
    return %c0_i32, %c0_i32_0 : i32, i32
  }
  func.func @transform_2(%arg0: i32) -> (i32, i32) {
    %c0_i32 = arith.constant 0 : i32
    %c0_i32_0 = arith.constant 0 : i32
    %c0_i32_1 = arith.constant 0 : i32
    return %c0_i32, %c0_i32_0 : i32, i32
  }
  func.func @transform_3(%arg0: i32) -> (i32, i32) {
    %c0_i32 = arith.constant 0 : i32
    %c0_i32_0 = arith.constant 0 : i32
    %c0_i32_1 = arith.constant 0 : i32
    return %c0_i32, %c0_i32_0 : i32, i32
  }
  func.func @transform_4(%arg0: i32) -> (i32, i32) {
    %c0_i32 = arith.constant 0 : i32
    %c0_i32_0 = arith.constant 0 : i32
    %c0_i32_1 = arith.constant 0 : i32
    return %c0_i32, %c0_i32_0 : i32, i32
  }
  func.func @transform_5(%arg0: i32) -> (i32, i32) {
    %c0_i32 = arith.constant 0 : i32
    %c0_i32_0 = arith.constant 0 : i32
    return %arg0, %c0_i32 : i32, i32
  }
}

</mosaic_0001>

<bundles_post_ra>
// kernel: tpu_custom_call.1
= control target key start
LH: loop header
LB: loop body
LE: loop exit
PB: predicated region body
PF: predicated region fallthrough
CT: control target
= control target key end

     0   :  { %10 = vsyncpa [#allocation3], 0  ;;  %s739_s0 = inlined_call_operand.hbm [shape: f32[8,32], index: 0, kind: input, shape index: {}]   ;;  %s740_s1 = inlined_call_operand.hbm [shape: f32[32,512], index: 1, kind: input, shape index: {}]   ;;  %s741_s2 = inlined_call_operand.hbm [shape: f32[1,512], index: 2, kind: input, shape index: {}]   ;;  %s742_s3 = inlined_call_operand.hbm [shape: f32[512,128], index: 3, kind: input, shape index: {}]   ;;  %s743_s4 = inlined_call_operand.vmem [shape: f32[1,128], index: 4, kind: input, shape index: {}]   ;;  %s744_s5 = inlined_call_operand.hbm [shape: f32[8,128], index: 5, kind: output, shape index: {}]  }
   0x1   :  { %11 = vsyncpa [#allocation6], 0 }
   0x2   :  { %12 = vsyncpa [#allocation9], 0 }
   0x3   :  { %13 = vsyncpa [#allocation4], 0  ;;  %s681_s18 = smov [#allocation5]  }
   0x4   :  { %s29_s19 = sshll.u32 %s681_s18, 4  ;;  %s30_s19 = int_to_ptr.vmem [resolvable:$true] %s29_s19 }
   0x5   :  { %s581_s20 = scalar_lea.vmem %s30_s19, 2048  ;;  %p586_p1 = scmp.lt.s32.totalorder %s30_s19, %s30_s19 }
   0x6   :  { %p582_p0 = scmp.ne.s32.totalorder %s30_s19, %s581_s20  ;;  %p587_p2 = scmp.lt.s32.totalorder %s581_s20, %s581_s20 }
   0x8   :  { %p588_p3 = por %p587_p2, %p586_p1 }
   0xa   :  { %p589_p4 = pnand %p588_p3, %p582_p0 }
   0xc   :  { %592 = shalt.err (!%p589_p4)
}
   0xd   :  { %s682_s21 = smov 512   ;;  %s683_s22 = smov 32  }
   0xe   :  { %35 = dma.hbm_to_vmem [thread:$0]  %s740_s1, 2048, %s30_s19, [#allocation6], %s682_s21, %s682_s21, %s683_s22  }
   0xf   :  { %s684_s25 = smov [#allocation2]   ;;  %s685_s27 = smov [#allocation7]  }
  0x10   :  { %s20_s26 = sshll.u32 %s684_s25, 4  ;;  %s42_s28 = sshll.u32 %s685_s27, 4  ;;  %s21_s26 = int_to_ptr.vmem [resolvable:$true] %s20_s26  ;;  %s43_s28 = int_to_ptr.vmem [resolvable:$true] %s42_s28 }
  0x11   :  { %s601_s29 = scalar_lea.vmem %s21_s26, 128  ;;  %p606_p6 = scmp.lt.s32.totalorder %s21_s26, %s21_s26 }
  0x12   :  { %p602_p5 = scmp.ne.s32.totalorder %s21_s26, %s601_s29  ;;  %p607_p7 = scmp.lt.s32.totalorder %s601_s29, %s601_s29 }
  0x14   :  { %p608_p8 = por %p607_p7, %p606_p6 }
  0x16   :  { %p609_p9 = pnand %p608_p8, %p602_p5 }
  0x18   :  { %612 = shalt.err (!%p609_p9)
}
  0x19   :  { %23 = dma.hbm_to_vmem [thread:$0]  %s739_s0, 128, %s21_s26, [#allocation3]  }
  0x1a   :  { %s621_s7 = scalar_lea.vmem %s43_s28, 64  ;;  %p626_p11 = scmp.lt.s32.totalorder %s43_s28, %s43_s28 }
  0x1b   :  { %p622_p10 = scmp.ne.s32.totalorder %s43_s28, %s621_s7  ;;  %p627_p12 = scmp.lt.s32.totalorder %s621_s7, %s621_s7 }
  0x1d   :  { %p628_p13 = por %p627_p12, %p626_p11 }
  0x1f   :  { %p629_p0 = pnand %p628_p13, %p622_p10 }
  0x21   :  { %632 = shalt.err (!%p629_p0)
}
  0x22   :  { %45 = dma.hbm_to_vmem [thread:$0]  %s741_s2, 64, %s43_s28, [#allocation6]  }
  0x23   :  { %s686_s9 = smov [#allocation8]  }
  0x24   :  { %s51_s10 = sshll.u32 %s686_s9, 4  ;;  %s52_s10 = int_to_ptr.vmem [resolvable:$true] %s51_s10 }
  0x25   :  { %s641_s11 = scalar_lea.vmem %s52_s10, 8192  ;;  %p646_p2 = scmp.lt.s32.totalorder %s52_s10, %s52_s10 }
  0x26   :  { %p642_p1 = scmp.ne.s32.totalorder %s52_s10, %s641_s11  ;;  %p647_p3 = scmp.lt.s32.totalorder %s641_s11, %s641_s11 }
  0x28   :  { %p648_p4 = por %p647_p3, %p646_p2 }
  0x2a   :  { %p649_p5 = pnand %p648_p4, %p642_p1 }
  0x2c   :  { %652 = shalt.err (!%p649_p5)
}
  0x2d   :  { %s687_s0 = smov 128   ;;  %s688_s12 = smov 8  }
  0x2e   :  { %57 = dma.hbm_to_vmem [thread:$0]  %s742_s3, 8192, %s52_s10, [#allocation9], %s687_s0, %s687_s0, %s688_s12  }
  0x2f   :  { %673 = dma.done.wait [#allocation3], 128  }
  0x30   :  { %674 = vsyncadd [#allocation3], 4294967168 }
  0x31   :  { %675 = dma.done.wait [#allocation6], 2112  }
  0x32   :  { %676 = vsyncadd [#allocation6], 4294965184 }
  0x33   :  { %677 = dma.done.wait [#allocation9], 8192  }
  0x34   :  { %678 = vsyncadd [#allocation9], 4294959104  ;;  %v689_v0 = vmov 0.0   ;;  %v86_v1 = vld [vmem:[#allocation5 + $0x68] sm:$0xff]  ;;  %v88_v2 = vld [vmem:[#allocation5 + $0x78] sm:$0xff]  ;;  %vm111_vm0 = vcmask 261120  }
  0x35   :  { %179 = vmatprep.mubr.f32.mxu0 %v689_v0  ;;  %250 = vmatprep.mubr.f32.mxu1 %v689_v0  ;;  %v85_v3 = vld [vmem:[#allocation5 + $0x60] sm:$0xff]  ;;  %v87_v4 = vld [vmem:[#allocation5 + $0x70] sm:$0xff]  ;;  %v82_v5 = vld [vmem:[#allocation5 + $0x48] sm:$0xff]  ;;  %s690_s15 = smov [#allocation10]  }
  0x36   :  { %139 = vmatprep.subr.mxu0 %v86_v1  ;;  %210 = vmatprep.subr.mxu1 %v88_v2  ;;  %v84_v6 = vld [vmem:[#allocation5 + $0x58] sm:$0xff]  ;;  %v81_v7 = vld [vmem:[#allocation5 + $0x40] sm:$0xff]  ;;  %v83_v8 = vld [vmem:[#allocation5 + $0x50] sm:$0xff]  ;;  %s479_s16 = sshll.u32 %s690_s15, 4  ;;  %s480_s16 = int_to_ptr.vmem [resolvable:$true] %s479_s16 }
  0x37   :  { %140 = vmatpush1.msra.mxu0 %v85_v3  ;;  %211 = vmatpush1.msra.mxu1 %v87_v4  ;;  %v78_v9 = vld [vmem:[#allocation5 + $0x28] sm:$0xff]  ;;  %v80_v10 = vld [vmem:[#allocation5 + $0x38] sm:$0xff]  ;;  %v77_v11 = vld [vmem:[#allocation5 + $0x20] sm:$0xff]  ;;  %s653_s17 = scalar_lea.vmem %s480_s16, 128  ;;  %p658_p7 = scmp.lt.s32.totalorder %s480_s16, %s480_s16 }
  0x38   :  { %141 = vmatprep.subr.mxu0 %v82_v5  ;;  %212 = vmatprep.subr.mxu1 %v84_v6  ;;  %v79_v12 = vld [vmem:[#allocation5 + $0x30] sm:$0xff]  ;;  %v74_v13 = vld [vmem:[#allocation5 + $0x8] sm:$0xff]  ;;  %v76_v14 = vld [vmem:[#allocation5 + $0x18] sm:$0xff]  ;;  %p654_p6 = scmp.ne.s32.totalorder %s480_s16, %s653_s17  ;;  %p659_p8 = scmp.lt.s32.totalorder %s653_s17, %s653_s17 }
  0x39   :  { %142 = vmatpush1.msra.mxu0 %v81_v7  ;;  %213 = vmatpush1.msra.mxu1 %v83_v8  ;;  %v73_v15 = vld [vmem:[#allocation5] sm:$0xff]  ;;  %v75_v16 = vld [vmem:[#allocation5 + $0x10] sm:$0xff]  ;;  %v72_v17 = vld [vmem:[#allocation2] sm:$0xff] }
  0x3a   :  { %143 = vmatprep.subr.mxu0 %v78_v9  ;;  %214 = vmatprep.subr.mxu1 %v80_v10  ;;  %v292_v18 = vld [vmem:[#allocation8 + $0xf8] sm:$0xff]  ;;  %v291_v22 = vld [vmem:[#allocation8 + $0xf0] sm:$0xff]  ;;  %v290_v26 = vld [vmem:[#allocation8 + $0xe8] sm:$0xff]  ;;  %p660_p9 = por %p659_p8, %p658_p7 }
  0x3b   :  { %144 = vmatpush1.msra.mxu0 %v77_v11  ;;  %215 = vmatpush1.msra.mxu1 %v79_v12  ;;  %v324_v19 = vld [vmem:[#allocation8 + $0x1f8] sm:$0xff]  ;;  %v323_v23 = vld [vmem:[#allocation8 + $0x1f0] sm:$0xff]  ;;  %v322_v27 = vld [vmem:[#allocation8 + $0x1e8] sm:$0xff] }
  0x3c   :  { %145 = vmatprep.subr.mxu0 %v74_v13  ;;  %216 = vmatprep.subr.mxu1 %v76_v14  ;;  %v276_v20 = vld [vmem:[#allocation8 + $0x78] sm:$0xff]  ;;  %v275_v24 = vld [vmem:[#allocation8 + $0x70] sm:$0xff]  ;;  %v274_v28 = vld [vmem:[#allocation8 + $0x68] sm:$0xff]  ;;  %p661_p10 = pnand %p660_p9, %p654_p6 }
  0x3d   :  { %146 = vmatpush1.msra.mxu0 %v73_v15  ;;  %217 = vmatpush1.msra.mxu1 %v75_v16  ;;  %v308_v21 = vld [vmem:[#allocation8 + $0x178] sm:$0xff]  ;;  %v307_v25 = vld [vmem:[#allocation8 + $0x170] sm:$0xff]  ;;  %v306_v29 = vld [vmem:[#allocation8 + $0x168] sm:$0xff] }
  0x3e   :  { %490 = vmatmul.mubr.msk.f32.vlgmr.msra.gmra.mxu0 %vm111_vm0, %v72_v17  ;;  %491 = vmatmul.mubr.msk.f32.vlgmr.msra.gmra.mxu1 %vm111_vm0, %v72_v17  ;;  %v289_v30 = vld [vmem:[#allocation8 + $0xe0] sm:$0xff]  ;;  %v288_v34 = vld [vmem:[#allocation8 + $0xd8] sm:$0xff]  ;;  %v287_v38 = vld [vmem:[#allocation8 + $0xd0] sm:$0xff] }
  0x3f   :  { %493 = vmatprep.subr.mxu0 %v292_v18  ;;  %528 = vmatprep.subr.mxu1 %v324_v19  ;;  %v321_v31 = vld [vmem:[#allocation8 + $0x1e0] sm:$0xff]  ;;  %v320_v35 = vld [vmem:[#allocation8 + $0x1d8] sm:$0xff]  ;;  %v319_v39 = vld [vmem:[#allocation8 + $0x1d0] sm:$0xff]  ;;  %v91_v18 = vlaneseq }
  0x40   :  { %494 = vmatpush3.msra.mxu0 %v276_v20  ;;  %529 = vmatpush3.msra.mxu1 %v308_v21  ;;  %v273_v32 = vld [vmem:[#allocation8 + $0x60] sm:$0xff]  ;;  %v272_v36 = vld [vmem:[#allocation8 + $0x58] sm:$0xff]  ;;  %v271_v40 = vld [vmem:[#allocation8 + $0x50] sm:$0xff] }
  0x41   :  { %495 = vmatprep.subr.mxu0 %v291_v22  ;;  %530 = vmatprep.subr.mxu1 %v323_v23  ;;  %v305_v33 = vld [vmem:[#allocation8 + $0x160] sm:$0xff]  ;;  %v304_v37 = vld [vmem:[#allocation8 + $0x158] sm:$0xff]  ;;  %v303_v41 = vld [vmem:[#allocation8 + $0x150] sm:$0xff]  ;;  %v92_v19 = vshrl.u32 %v91_v18, 7 }
  0x42   :  { %496 = vmatpush3.msra.mxu0 %v275_v24  ;;  %531 = vmatpush3.msra.mxu1 %v307_v25  ;;  %v286_v42 = vld [vmem:[#allocation8 + $0xc8] sm:$0xff]  ;;  %v285_v46 = vld [vmem:[#allocation8 + $0xc0] sm:$0xff]  ;;  %v284_v50 = vld [vmem:[#allocation8 + $0xb8] sm:$0xff] }
  0x43   :  { %497 = vmatprep.subr.mxu0 %v290_v26  ;;  %532 = vmatprep.subr.mxu1 %v322_v27  ;;  %v318_v43 = vld [vmem:[#allocation8 + $0x1c8] sm:$0xff]  ;;  %v317_v47 = vld [vmem:[#allocation8 + $0x1c0] sm:$0xff]  ;;  %v316_v51 = vld [vmem:[#allocation8 + $0x1b8] sm:$0xff]  ;;  %v101_v20 = vsub.s32 2, %v92_v19  ;;  %v93_v21 = vsub.s32 0, %v92_v19  ;;  %v97_v23 = vsub.s32 1, %v92_v19 }
  0x44   :  { %498 = vmatpush3.msra.mxu0 %v274_v28  ;;  %533 = vmatpush3.msra.mxu1 %v306_v29  ;;  %v270_v44 = vld [vmem:[#allocation8 + $0x48] sm:$0xff]  ;;  %v269_v48 = vld [vmem:[#allocation8 + $0x40] sm:$0xff]  ;;  %v268_v52 = vld [vmem:[#allocation8 + $0x38] sm:$0xff]  ;;  %v105_v24 = vsub.s32 3, %v92_v19 }
  0x45   :  { %499 = vmatprep.subr.mxu0 %v289_v30  ;;  %534 = vmatprep.subr.mxu1 %v321_v31  ;;  %v302_v45 = vld [vmem:[#allocation8 + $0x148] sm:$0xff]  ;;  %v301_v49 = vld [vmem:[#allocation8 + $0x140] sm:$0xff]  ;;  %v300_v53 = vld [vmem:[#allocation8 + $0x138] sm:$0xff] }
  0x46   :  { %500 = vmatpush3.msra.mxu0 %v273_v32  ;;  %535 = vmatpush3.msra.mxu1 %v305_v33  ;;  %v283_v54 = vld [vmem:[#allocation8 + $0xb0] sm:$0xff]  ;;  %v282_v58 = vld [vmem:[#allocation8 + $0xa8] sm:$0xff]  ;;  %v281_v62 = vld [vmem:[#allocation8 + $0xa0] sm:$0xff] }
  0x47   :  { %501 = vmatprep.subr.mxu0 %v288_v34  ;;  %536 = vmatprep.subr.mxu1 %v320_v35  ;;  %v315_v55 = vld [vmem:[#allocation8 + $0x1b0] sm:$0xff]  ;;  %v314_v59 = vld [vmem:[#allocation8 + $0x1a8] sm:$0xff]  ;;  %v313_v63 = vld [vmem:[#allocation8 + $0x1a0] sm:$0xff] }
  0x48   :  { %502 = vmatpush3.msra.mxu0 %v272_v36  ;;  %537 = vmatpush3.msra.mxu1 %v304_v37  ;;  %v267_v56 = vld [vmem:[#allocation8 + $0x30] sm:$0xff]  ;;  %v266_v60 = vld [vmem:[#allocation8 + $0x28] sm:$0xff]  ;;  %v265_v0 = vld [vmem:[#allocation8 + $0x20] sm:$0xff] }
  0x49   :  { %503 = vmatprep.subr.mxu0 %v287_v38  ;;  %538 = vmatprep.subr.mxu1 %v319_v39  ;;  %v299_v57 = vld [vmem:[#allocation8 + $0x130] sm:$0xff]  ;;  %v298_v61 = vld [vmem:[#allocation8 + $0x128] sm:$0xff]  ;;  %v297_v1 = vld [vmem:[#allocation8 + $0x120] sm:$0xff] }
  0x4a   :  { %504 = vmatpush3.msra.mxu0 %v271_v40  ;;  %539 = vmatpush3.msra.mxu1 %v303_v41  ;;  %v280_v2 = vld [vmem:[#allocation8 + $0x98] sm:$0xff]  ;;  %v279_v6 = vld [vmem:[#allocation8 + $0x90] sm:$0xff]  ;;  %v278_v10 = vld [vmem:[#allocation8 + $0x88] sm:$0xff] }
  0x4b   :  { %505 = vmatprep.subr.mxu0 %v286_v42  ;;  %540 = vmatprep.subr.mxu1 %v318_v43  ;;  %v312_v3 = vld [vmem:[#allocation8 + $0x198] sm:$0xff]  ;;  %v311_v7 = vld [vmem:[#allocation8 + $0x190] sm:$0xff]  ;;  %v310_v11 = vld [vmem:[#allocation8 + $0x188] sm:$0xff] }
  0x4c   :  { %506 = vmatpush3.msra.mxu0 %v270_v44  ;;  %541 = vmatpush3.msra.mxu1 %v302_v45  ;;  %v264_v4 = vld [vmem:[#allocation8 + $0x18] sm:$0xff]  ;;  %v263_v8 = vld [vmem:[#allocation8 + $0x10] sm:$0xff]  ;;  %v262_v12 = vld [vmem:[#allocation8 + $0x8] sm:$0xff] }
  0x4d   :  { %507 = vmatprep.subr.mxu0 %v285_v46  ;;  %542 = vmatprep.subr.mxu1 %v317_v47  ;;  %v296_v5 = vld [vmem:[#allocation8 + $0x118] sm:$0xff]  ;;  %v295_v9 = vld [vmem:[#allocation8 + $0x110] sm:$0xff]  ;;  %v294_v13 = vld [vmem:[#allocation8 + $0x108] sm:$0xff] }
  0x4e   :  { %508 = vmatpush3.msra.mxu0 %v269_v48  ;;  %543 = vmatpush3.msra.mxu1 %v301_v49  ;;  %v277_v14 = vld [vmem:[#allocation8 + $0x80] sm:$0xff]  ;;  %v89_v22 = vld [vmem:[#allocation7] sm:$0xf]  ;;  %v492_v43 = vld [vmem:[%s743_s4] ss:$0 sm:$0xff] }
  0x4f   :  { %509 = vmatprep.subr.mxu0 %v284_v50  ;;  %544 = vmatprep.subr.mxu1 %v316_v51  ;;  %v309_v15 = vld [vmem:[#allocation8 + $0x180] sm:$0xff]  ;;  %v102_v25 = vrot.slane %v89_v22, %v101_v20  ;;  %v94_v26 = vrot.slane %v89_v22, %v93_v21  ;;  %v98_v27 = vrot.slane %v89_v22, %v97_v23 }
  0x50   :  { %510 = vmatpush3.msra.mxu0 %v268_v52  ;;  %545 = vmatpush3.msra.mxu1 %v300_v53  ;;  %v261_v16 = vld [vmem:[#allocation8] sm:$0xff]  ;;  %v106_v28 = vrot.slane %v89_v22, %v105_v24 }
  0x51   :  { %511 = vmatprep.subr.mxu0 %v283_v54  ;;  %546 = vmatprep.subr.mxu1 %v315_v55  ;;  %v293_v17 = vld [vmem:[#allocation8 + $0x100] sm:$0xff] }
  0x52   :  { %512 = vmatpush3.msra.mxu0 %v267_v56  ;;  %547 = vmatpush3.msra.mxu1 %v299_v57 }
  0x53   :  { %513 = vmatprep.subr.mxu0 %v282_v58  ;;  %548 = vmatprep.subr.mxu1 %v314_v59 }
  0x54   :  { %514 = vmatpush3.msra.mxu0 %v266_v60  ;;  %549 = vmatpush3.msra.mxu1 %v298_v61 }
  0x55   :  { %515 = vmatprep.subr.mxu0 %v281_v62  ;;  %550 = vmatprep.subr.mxu1 %v313_v63 }
  0x56   :  { %516 = vmatpush3.msra.mxu0 %v265_v0  ;;  %551 = vmatpush3.msra.mxu1 %v297_v1 }
  0x57   :  { %517 = vmatprep.subr.mxu0 %v280_v2  ;;  %552 = vmatprep.subr.mxu1 %v312_v3 }
  0x58   :  { %518 = vmatpush3.msra.mxu0 %v264_v4  ;;  %553 = vmatpush3.msra.mxu1 %v296_v5 }
  0x59   :  { %519 = vmatprep.subr.mxu0 %v279_v6  ;;  %554 = vmatprep.subr.mxu1 %v311_v7 }
  0x5a   :  { %520 = vmatpush3.msra.mxu0 %v263_v8  ;;  %555 = vmatpush3.msra.mxu1 %v295_v9 }
  0x5b   :  { %521 = vmatprep.subr.mxu0 %v278_v10  ;;  %556 = vmatprep.subr.mxu1 %v310_v11 }
  0x5c   :  { %522 = vmatpush3.msra.mxu0 %v262_v12  ;;  %557 = vmatpush3.msra.mxu1 %v294_v13 }
  0x5d   :  { %523 = vmatprep.subr.mxu0 %v277_v14  ;;  %558 = vmatprep.subr.mxu1 %v309_v15 }
  0x5e   :  { %524 = vmatpush3.msra.mxu0 %v261_v16  ;;  %559 = vmatpush3.msra.mxu1 %v293_v17 }
  0xfe   :  { %v181_v29 = vpop.f32.mrf.mxu0  ;;  %v252_v30 = vpop.f32.mrf.mxu1 }
  0xff   :  { %v253_v31 = vadd.f32 %v252_v30, %v102_v25  ;;  %v182_v32 = vadd.f32 %v181_v29, %v94_v26 }
 0x100   :  { %v183_v33 = vpop.f32.mrf.mxu0  ;;  %v254_v34 = vpop.f32.mrf.mxu1 }
 0x101   :  { %v184_v35 = vadd.f32 %v183_v33, %v98_v27  ;;  %v255_v36 = vadd.f32 %v254_v34, %v106_v28  ;;  %v259_v37 = vmax.f32 %v253_v31, 0.0  ;;  %v257_v40 = vmax.f32 %v182_v32, 0.0 }
 0x103   :  { %v258_v38 = vmax.f32 %v184_v35, 0.0  ;;  %v260_v39 = vmax.f32 %v255_v36, 0.0 }
 0x105   :  { %396 = vmatprep.mubr.f32.mxu0 %v258_v38  ;;  %466 = vmatprep.mubr.f32.mxu1 %v260_v39 }
 0x106   :  { %397 = vmatmul.mubr.f32.vlgmr.msra.gmra.mxu0 %v257_v40  ;;  %467 = vmatmul.mubr.f32.vlgmr.msra.gmra.mxu1 %v259_v37 }
 0x1c6   :  { %v525_v41 = vpop.f32.mrf.mxu0  ;;  %v560_v42 = vpop.f32.mrf.mxu1 }
 0x1c8   :  { %v526_v44 = vpop.f32.mrf.mxu0  ;;  %v561_v45 = vpop.f32.mrf.mxu1 }
 0x1c9   :  { %v527_v46 = vadd.f32 %v526_v44, %v525_v41  ;;  %v562_v48 = vadd.f32 %v561_v45, %v560_v42 }
 0x1cb   :  { %v399_v47 = vadd.f32 %v527_v46, %v492_v43 }
 0x1cd   :  { %v469_v49 = vadd.f32 %v562_v48, %v399_v47 }
 0x1cf   :  { %472 = vst [vmem:[#allocation10] sm:$0xff] %v469_v49 }
 0x1d0   :  { %664 = shalt.err (!%p661_p10)
}
 0x1d1   :  { %482 = dma.vmem_to_hbm [thread:$0]  %s480_s16, 128, %s744_s5, [#allocation4]  }
 0x1d2   :  { %679 = dma.done.wait [#allocation4], 128  }
 0x1d3   :  { %680 = vsyncadd [#allocation4], 4294967168 }
 0x1d4   :  { %486 = vsyncpa [#allocation3], 1 }
 0x1d5   :  { %487 = vsyncpa [#allocation6], 1 }
 0x1d6   :  { %488 = vsyncpa [#allocation9], 1 }
 0x1d7   :  { %489 = vsyncpa [#allocation4], 1 }

</bundles_post_ra>
